<compile_context>
chip_gen: v5e
topology: v5e:2x2
jax: 0.10.0
libtpu: 0.0.40
codegen_flags: <defaults>
</compile_context>

<pallas_src>
import jax
import jax.numpy as jnp
from jax.experimental import pallas as pl
from jax.experimental.pallas import tpu as pltpu


def _round_up(x, m):
    return (x + m - 1) // m * m


def _eq_conv2d_kernel(p_ref, w_ref, b_ref, o_ref):
    """One (cout-tile, image, m-tile) step: a single MXU matmul + bias epilogue.

    p_ref : VMEM [tm, Kp]   im2col patches (batch dim squeezed), bf16/f32
    w_ref : VMEM [Kp, tn]   scale-folded, flattened weight tile
    b_ref : VMEM [1, tn]    f32 bias tile
    o_ref : VMEM [tm, tn]   f32 output tile (lane-dense)
    """
    acc = jax.lax.dot_general(
        p_ref[...], w_ref[...],
        dimension_numbers=(((1,), (0,)), ((), ())),
        preferred_element_type=jnp.float32,
    )
    o_ref[...] = (acc + b_ref[...]).astype(o_ref.dtype)


def equalized_conv2d_forward(x, weight_norm, bias, scale, *, stride=1, pad=0,
                             compute_dtype=jnp.bfloat16):
    """Forward pass of the equalized conv layer.

    x           : [B, Cin, H, W]        f32 (NCHW, as in PyTorch)
    weight_norm : [Cout, Cin, k, k]     f32 (OIHW stored / normalized weight)
    bias        : [Cout]                f32
    scale       : scalar (python float or traced) equalized-lr scale
    Returns     : [B, Cout, Ho, Wo]     f32
    """
    b, c_in, h, w = x.shape
    c_out, _, k_size, _ = weight_norm.shape
    h_out = (h + 2 * pad - k_size) // stride + 1
    w_out = (w + 2 * pad - k_size) // stride + 1

    # ---- one-time layout / scale plumbing (outside the kernel) ----------------
    # conv(x*s, W) == conv(x, W*s): fold the equalized-lr scale into the weight.
    w_hwio = (weight_norm * jnp.asarray(scale, weight_norm.dtype)
              ).transpose(2, 3, 1, 0)                       # OIHW -> HWIO
    k_dim = k_size * k_size * c_in
    w_mat = w_hwio.reshape(k_dim, c_out).astype(compute_dtype)

    # Full im2col: fuses the k*k taps into the MXU contraction axis (K = k*k*Cin).
    # Stride is handled here via strided slicing, so the kernel is stride-free.
    # TODO(synk): the im2col replicates activations ~k^2x in HBM; for very large
    # kernels/resolutions a halo-tiled in-kernel gather would save that traffic.
    x_nhwc = jnp.transpose(x, (0, 2, 3, 1))
    x_pad = jnp.pad(x_nhwc, ((0, 0), (pad, pad), (pad, pad), (0, 0)))
    taps = []
    for ky in range(k_size):
        for kx in range(k_size):
            taps.append(
                x_pad[:, ky:ky + (h_out - 1) * stride + 1:stride,
                      kx:kx + (w_out - 1) * stride + 1:stride, :])
    patches = jnp.concatenate(taps, axis=-1)                # [B, Ho, Wo, k*k*Cin]
    m = h_out * w_out
    patches = patches.reshape(b, m, k_dim).astype(compute_dtype)

    # ---- lane-dense padding: K and Cout -> multiples of 128 --------------------
    k_pad = _round_up(k_dim, 128)
    c_out_pad = _round_up(c_out, 128)
    tn = 256 if c_out_pad % 256 == 0 else 128

    # ---- M (= Ho*Wo) tile: biggest tile that keeps per-step blocks in budget ---
    esz = jnp.dtype(compute_dtype).itemsize

    def _blk_bytes(tm_):
        return (2 * tm_ * k_pad * esz        # double-buffered patches
                + 2 * k_pad * tn * esz       # double-buffered weight tile
                + 2 * tm_ * tn * 4           # double-buffered f32 output
                + 2 * tn * 4)                # bias

    tm = min(512, _round_up(m, 8))
    while tm > 8 and _blk_bytes(tm) > 22 * 1024 * 1024:
        tm = _round_up(tm // 2, 8)
    m_pad = _round_up(m, tm)

    patches = jnp.pad(patches, ((0, 0), (0, m_pad - m), (0, k_pad - k_dim)))
    w_mat = jnp.pad(w_mat, ((0, k_pad - k_dim), (0, c_out_pad - c_out)))
    bias2d = jnp.pad(bias.astype(jnp.float32).reshape(1, c_out),
                     ((0, 0), (0, c_out_pad - c_out)))

    n_j = c_out_pad // tn
    n_m = m_pad // tm

    out_flat = pl.pallas_call(
        _eq_conv2d_kernel,
        out_shape=jax.ShapeDtypeStruct((b, m_pad, c_out_pad), jnp.float32),
        # cout-tile axis slowest: the weight slab is DMA'd once per tile and
        # reused across the whole (batch, m) sweep.
        grid=(n_j, b, n_m),
        in_specs=[
            pl.BlockSpec((None, tm, k_pad), lambda j, bi, mi: (bi, mi, 0)),
            pl.BlockSpec((k_pad, tn), lambda j, bi, mi: (0, j)),
            pl.BlockSpec((1, tn), lambda j, bi, mi: (0, j)),
        ],
        out_specs=pl.BlockSpec((None, tm, tn), lambda j, bi, mi: (bi, mi, j)),
        compiler_params=pltpu.CompilerParams(
            dimension_semantics=("parallel", "parallel", "parallel"),
            vmem_limit_bytes=32 * 1024 * 1024,
        ),
    )(patches, w_mat, bias2d)

    out = out_flat[:, :m, :c_out].reshape(b, h_out, w_out, c_out)
    return jnp.transpose(out, (0, 3, 1, 2)).astype(x.dtype)


def make_params(key, c_in, c_out, k_size):
    """Parameter init matching the PyTorch module __init__."""
    fan_in = c_in * k_size * k_size
    kw, kb = jax.random.split(key)
    w = jax.random.normal(kw, (c_out, c_in, k_size, k_size), jnp.float32) / jnp.sqrt(
        jnp.float32(fan_in))
    scale = 2.0 / jnp.sqrt(jnp.float32(fan_in))   # 2 / sqrt(fan_in)
    w_norm = w / scale                            # stored (normalized) weight
    # module inits bias to zeros; use nonzero values so the bias-add path is checked.
    bias = 0.1 * jax.random.normal(kb, (c_out,), jnp.float32)
    return w_norm, bias, scale


if __name__ == "__main__":
    key = jax.random.PRNGKey(0)
    kx_, kp_ = jax.random.split(key)

    B, C_in, H, W = 2, 4, 16, 16
    C_out, K, STRIDE, PAD = 8, 3, 1, 1

    x = jax.random.normal(kx_, (B, C_in, H, W), jnp.float32)
    w_norm, b_param, scale = make_params(kp_, C_in, C_out, K)

    # plain-JAX reference of the PyTorch forward: conv2d(x*scale, W_norm) + bias
    ref = jax.lax.conv_general_dilated(
        x * scale, w_norm,
        window_strides=(STRIDE, STRIDE),
        padding=((PAD, PAD), (PAD, PAD)),
        dimension_numbers=("NCHW", "OIHW", "NCHW"),
    ) + b_param[None, :, None, None]

    # f32 compute path: tight check of the im2col / matmul / bias plumbing.
    out_f32 = equalized_conv2d_forward(
        x, w_norm, b_param, scale, stride=STRIDE, pad=PAD,
        compute_dtype=jnp.float32)
    out_f32 = jax.block_until_ready(out_f32)
    assert out_f32.shape == (B, C_out, H, W)
    assert jnp.allclose(out_f32, ref, atol=1e-5, rtol=1e-5), \
        float(jnp.max(jnp.abs(out_f32 - ref)))

    # bf16 compute path (the fast MXU path, default): bf16 input quantization
    # only, f32 accumulation -> loose tolerance vs. unit-scale outputs.
    out_bf16 = equalized_conv2d_forward(
        x, w_norm, b_param, scale, stride=STRIDE, pad=PAD)
    out_bf16 = jax.block_until_ready(out_bf16)
    assert out_bf16.shape == (B, C_out, H, W)
    assert jnp.allclose(out_bf16, ref, atol=6e-2, rtol=6e-2), \
        float(jnp.max(jnp.abs(out_bf16 - ref)))

    print("KERNEL_OK")
</pallas_src>

<mosaic_0001>
module attributes {stable_mosaic.version = 11 : i64} {
  func.func @_eq_conv2d_kernel(%arg0: i32, %arg1: i32, %arg2: i32, %arg3: memref<1x256x128xf32, #tpu.memory_space<vmem>>, %arg4: memref<128x128xf32, #tpu.memory_space<vmem>>, %arg5: memref<1x128xf32, #tpu.memory_space<vmem>>, %arg6: memref<1x256x128xf32, #tpu.memory_space<vmem>>) attributes {dimension_semantics = [#tpu.dimension_semantics<parallel>, #tpu.dimension_semantics<parallel>, #tpu.dimension_semantics<parallel>], iteration_bounds = array<i64: 1, 2, 1>, scalar_prefetch = 0 : i64, scratch_operands = 0 : i64, tpu.core_type = #tpu.core_type<tc>, window_params = [{transform_indices = @transform_0, window_bounds = array<i64: 1, 256, 128>}, {transform_indices = @transform_1, window_bounds = array<i64: 128, 128>}, {transform_indices = @transform_2, window_bounds = array<i64: 1, 128>}, {transform_indices = @transform_3, window_bounds = array<i64: 1, 256, 128>}]} {
    %c0 = arith.constant 0 : index
    %c0_0 = arith.constant 0 : index
    %c0_1 = arith.constant 0 : index
    %0 = vector.load %arg3[%c0, %c0_0, %c0_1] : memref<1x256x128xf32, #tpu.memory_space<vmem>>, vector<1x256x128xf32>
    %1 = vector.shape_cast %0 : vector<1x256x128xf32> to vector<256x128xf32>
    %c0_2 = arith.constant 0 : index
    %c0_3 = arith.constant 0 : index
    %2 = vector.load %arg4[%c0_2, %c0_3] : memref<128x128xf32, #tpu.memory_space<vmem>>, vector<128x128xf32>
    %cst = arith.constant dense<0.000000e+00> : vector<256x128xf32>
    %3 = tpu.matmul %1, %2, %cst {dimension_numbers = #tpu.dot_dimension_numbers<[1], [0], [0], [1], [0, 0, 1, 1], [], []>} : vector<256x128xf32>, vector<128x128xf32>, vector<256x128xf32> -> vector<256x128xf32>
    %c0_4 = arith.constant 0 : index
    %c0_5 = arith.constant 0 : index
    %4 = vector.load %arg5[%c0_4, %c0_5] : memref<1x128xf32, #tpu.memory_space<vmem>>, vector<1x128xf32>
    %5 = vector.broadcast %4 : vector<1x128xf32> to vector<256x128xf32>
    %6 = arith.addf %3, %5 : vector<256x128xf32>
    %c0_6 = arith.constant 0 : index
    %c0_7 = arith.constant 0 : index
    %c0_8 = arith.constant 0 : index
    %7 = vector.load %arg6[%c0_6, %c0_7, %c0_8] : memref<1x256x128xf32, #tpu.memory_space<vmem>>, vector<1x256x128xf32>
    %8 = vector.shape_cast %7 : vector<1x256x128xf32> to vector<256x128xf32>
    %9 = vector.shape_cast %6 : vector<256x128xf32> to vector<1x256x128xf32>
    tpu.vector_store %arg6[%c0_6, %c0_7, %c0_8], %9 {strides = array<i32>} : memref<1x256x128xf32, #tpu.memory_space<vmem>>, vector<1x256x128xf32>,
    return
  }
  func.func @transform_0(%arg0: i32, %arg1: i32, %arg2: i32) -> (i32, i32, i32) {
    %c0_i32 = arith.constant 0 : i32
    %c0_i32_0 = arith.constant 0 : i32
    return %arg1, %arg2, %c0_i32 : i32, i32, i32
  }
  func.func @transform_1(%arg0: i32, %arg1: i32, %arg2: i32) -> (i32, i32) {
    %c0_i32 = arith.constant 0 : i32
    %c0_i32_0 = arith.constant 0 : i32
    return %c0_i32, %arg0 : i32, i32
  }
  func.func @transform_2(%arg0: i32, %arg1: i32, %arg2: i32) -> (i32, i32) {
    %c0_i32 = arith.constant 0 : i32
    %c0_i32_0 = arith.constant 0 : i32
    return %c0_i32, %arg0 : i32, i32
  }
  func.func @transform_3(%arg0: i32, %arg1: i32, %arg2: i32) -> (i32, i32, i32) {
    %c0_i32 = arith.constant 0 : i32
    return %arg1, %arg2, %arg0 : i32, i32, i32
  }
}

</mosaic_0001>

<bundles_post_ra>
// kernel: tpu_custom_call.1
= control target key start
LH: loop header
LB: loop body
LE: loop exit
PB: predicated region body
PF: predicated region fallthrough
CT: control target
= control target key end

     0   :  { %s1173_s0 = inlined_call_operand.hbm [shape: f32[2,256,128], index: 0, kind: input, shape index: {}]   ;;  %s1174_s1 = inlined_call_operand.hbm [shape: f32[128,128], index: 1, kind: input, shape index: {}]   ;;  %s1175_s2 = inlined_call_operand.vmem [shape: f32[1,128], index: 2, kind: input, shape index: {}]   ;;  %s1176_s3 = inlined_call_operand.hbm [shape: f32[2,256,128], index: 3, kind: output, shape index: {}]  }
   0x1   :  { %1178 = sst [smem:[#allocation11_spill]] %s1174_s1 }
   0x2   :  { %8 = vsyncpa [#allocation3], 0 }
   0x3   :  { %10 = vsyncpa [#allocation3 + $0x1], 0 }
   0x4   :  { %11 = vsyncpa [#allocation6], 0 }
   0x5   :  { %12 = vsyncpa [#allocation4], 0 }
   0x6   :  { %14 = vsyncpa [#allocation4 + $0x1], 0  ;;  %s908_s12 = smov 0   ;;  %s910_s13 = smov 0  }
   0x7   :  { %s912_s14 = smov 0   ;;  %s914_s15 = smov 0  }
   0x8   :  { %s916_s16 = smov 0   ;;  %s918_s17 = smov 0  }
   0x9 LB: > { %s589_s18 = sadd.s32 4294967295, %s881_s17   ;;  %s590_s19 = sadd.s32 4294967294, %s881_s17   ;;  %s881_s17 = sphi %s918_s17, %s20_s17   ;;  %s877_s16 = sphi %s916_s16, %s1192_s16   ;;  %s873_s15 = sphi %s914_s15, %s1191_s15   ;;  %s869_s14 = sphi %s912_s14, %s1190_s14   ;;  %s865_s13 = sphi %s910_s13, %s1189_s13   ;;  %s861_s12 = sphi %s908_s12, %s1188_s12  }
   0xa   : > { %p61_p0 = scmp.ne.s32.totalorder %s865_s13, %s861_s12  ;;  %p942_p1 = scmp.eq.s32.totalorder %s589_s18, 0 }
   0xb   : > { %p946_p2 = scmp.eq.s32.totalorder %s589_s18, 1  ;;  %p147_p3 = scmp.eq.s32.totalorder %s590_s19, 1 }
   0xc   : > { %p952_p4 = por %p942_p1, %p61_p0  ;;  %p591_p5 = scmp.ge.s32.totalorder %s881_s17, 1 }
   0xd   : > { %p957_p6 = por %p147_p3, %p61_p0  ;;  %p154_p7 = scmp.lt.s32.totalorder %s881_s17, 3 }
   0xe   : > { %s1183_s1 = sld [smem:[#allocation11_spill]]  ;;  %s883_s28 = smov [#allocation5]  }
   0xf   : > { %p965_p8 = pnand %p591_p5, %p154_p7  ;;  %s169_s29 = sshll.u32 %s883_s28, 4  ;;  %s170_s29 = int_to_ptr.vmem [resolvable:$true] %s169_s29 }
  0x10   : > { %p594_p11 = scmp.ge.s32.totalorder %s881_s17, 2  ;;  %s1177_s30 = smov 128  }
  0x11   : > { %p665_p9 = pneg %p965_p8  ;;  %s885_s4 = smov 8  }
  0x12   : > { %s35_s5 = sadd.s32 1, %s877_s16  ;;  %s48_s6 = sadd.s32 1, %s869_s14 }
  0x13   : > { %p666_p10 = pnand %p665_p9, %p942_p1  ;;  %p37_p12 = scmp.ge.s32.totalorder %s35_s5, 2 }
  0x14   : > { %s167_s26 = sshll.u32 %s1183_s1, 4  ;;  %p55_p13 = scmp.ne.s32.totalorder %s869_s14, %s865_s13  ;;  %s168_s26 = int_to_ptr.hbm [resolvable:$true] %s167_s26 }
  0x15   : > { %668 = dma.hbm_to_vmem [thread:$0]  (!%p666_p10), %s168_s26, 2048, %s170_s29, [#allocation6], %s1177_s30, %s1177_s30, %s885_s4  }
  0x16   : > { %p56_p0 = scmp.eq.s32.totalorder %s881_s17, 0  ;;  %s1194_s5 = smov (%p37_p12, %s35_s5), 0 }
  0x17   : > { %p990_p5 = por %p946_p2, %p55_p13  ;;  %s43_s9 = ssub.s32 %s877_s16, %s1194_s5 }
  0x18   : > { %p984_p3 = por %p56_p0, %p55_p13  ;;  %p678_p7 = scmp.lt.s32.totalorder %s881_s17, 2 }
  0x19   : > { %p46_p9 = scmp.eq.s32.totalorder %s43_s9, 0  ;;  %s189_s10 = sand.u32 1, %s869_s14  }
  0x1a   : > { %s595_s11 = sshll.u32 %s189_s10, 8  ;;  %s607_s19 = sshll.u32 %s877_s16, 8 }
  0x1b   : > { %s999_s18 = scalar_select %p46_p9, %s869_s14, %s48_s6  }
  0x1c   : > { %s200_s26 = scalar_lea.hbm %s1173_s0, %s607_s19  ;;  %s193_s28 = scalar_lea.vmem [#allocation2], %s595_s11 }
  0x1d   : > { %s203_s29 = sshll.u32 %s193_s28, 4  ;;  %s201_s21 = sshll.u32 %s200_s26, 4  ;;  %s204_s29 = int_to_ptr.vmem [resolvable:$true] %s203_s29  ;;  %s202_s21 = int_to_ptr.hbm [resolvable:$true] %s201_s21 }
  0x1e   : > { %p670_p2 = pnand %p678_p7, %p984_p3  ;;  %s190_s30 = scalar_lea.sflag [#allocation3], %s189_s10 }
  0x1f   : > { %s1187_s1 = smov 128   ;;  %215 = sbr.rel (%p965_p8) target bundleno = 266 (0x10a), region = 32 }
  0x20   : > { %672 = dma.hbm_to_vmem [thread:$0]  (!%p670_p2), %s202_s21, 4096, %s204_s29, %s190_s30, %s1187_s1, %s1187_s1, %s885_s4  }
  0x21   : > { %s1013_s6 = sand.u32 (!%p965_p8), 1, %s865_s13  }
  0x22   : > { %s599_s9 = sshll.u32 (!%p965_p8), %s1013_s6, 8  ;;  %s218_s11 = scalar_lea.sflag (!%p965_p8), [#allocation3], %s1013_s6 }
  0x23   : > { %s1019_s7 = scalar_lea.vmem (!%p965_p8), [#allocation2], %s599_s9 }
  0x24   : > { %848 = dma.done.wait (%p952_p4), %s218_s11, 4096  }
  0x25   : > { %850 = vsyncadd (%p952_p4), %s218_s11, 4294963200 }
  0x26   : > { %852 = dma.done.wait (%p942_p1), [#allocation6], 2048  }
  0x27   : > { %854 = vsyncadd (%p942_p1), [#allocation6], 4294965248  ;;  %v305_v0 = vld [vmem:[#allocation5 + $0x78] sm:$0xff]  ;;  %v304_v1 = vld [vmem:[#allocation5 + $0x70] sm:$0xff]  ;;  %s1070_s22 = scalar_lea.vmem [#allocation7], %s599_s9  ;;  %s608_s27 = sshll.u32 %s873_s15, 8 }
  0x28   : > { %610 = vmatpush.msra.mxu2 %v305_v0  ;;  %611 = vmatpush.msra.mxu3 %v305_v0  ;;  %v303_v2 = vld [vmem:[#allocation5 + $0x68] sm:$0xff]  ;;  %v302_v3 = vld [vmem:[#allocation5 + $0x60] sm:$0xff]  ;;  %v301_v4 = vld [vmem:[#allocation5 + $0x58] sm:$0xff]  ;;  %s470_s10 = scalar_lea.hbm %s1176_s3, %s608_s27  ;;  %s471_s15 = sshll.u32 %s1070_s22, 4  ;;  %s472_s15 = int_to_ptr.vmem [resolvable:$true] %s471_s15 }
  0x29   : > { %310 = vmatpush.msra.mxu0 %v305_v0  ;;  %609 = vmatpush.msra.mxu1 %v305_v0  ;;  %v300_v5 = vld [vmem:[#allocation5 + $0x50] sm:$0xff]  ;;  %v299_v6 = vld [vmem:[#allocation5 + $0x48] sm:$0xff]  ;;  %v298_v7 = vld [vmem:[#allocation5 + $0x40] sm:$0xff]  ;;  %s473_s19 = sshll.u32 %s470_s10, 4  ;;  %s456_s24 = scalar_lea.sflag [#allocation4], %s1013_s6  ;;  %s474_s19 = int_to_ptr.hbm [resolvable:$true] %s473_s19 }
  0x2a   : > { %613 = vmatpush.msra.mxu2 %v304_v1  ;;  %614 = vmatpush.msra.mxu3 %v304_v1  ;;  %v297_v8 = vld [vmem:[#allocation5 + $0x38] sm:$0xff]  ;;  %v296_v9 = vld [vmem:[#allocation5 + $0x30] sm:$0xff]  ;;  %v295_v10 = vld [vmem:[#allocation5 + $0x28] sm:$0xff]  ;;  %s809_s25 = sshra.s32 %s474_s19, 4  ;;  %s815_s21 = scalar_lea.hbm %s1176_s3, 512  ;;  %s810_s25 = int_to_ptr.hbm [resolvable:$true] %s809_s25 }
  0x2b   : > { %311 = vmatpush.msra.mxu0 %v304_v1  ;;  %612 = vmatpush.msra.mxu1 %v304_v1  ;;  %v294_v11 = vld [vmem:[#allocation5 + $0x20] sm:$0xff]  ;;  %v293_v12 = vld [vmem:[#allocation5 + $0x18] sm:$0xff]  ;;  %v292_v13 = vld [vmem:[#allocation5 + $0x10] sm:$0xff]  ;;  %s811_s26 = scalar_lea.hbm %s810_s25, 256  ;;  %p816_p10 = scmp.lt.s32.totalorder %s810_s25, %s1176_s3 }
  0x2c   : > { %616 = vmatpush.msra.mxu2 %v303_v2  ;;  %617 = vmatpush.msra.mxu3 %v303_v2  ;;  %v291_v14 = vld [vmem:[#allocation5 + $0x8] sm:$0xff]  ;;  %v290_v15 = vld [vmem:[#allocation5] sm:$0xff]  ;;  %v276_v24 = vld [vmem:[%s1019_s7 + $0x90] sm:$0xff]  ;;  %p812_p1 = scmp.ne.s32.totalorder %s810_s25, %s811_s26  ;;  %p817_p12 = scmp.lt.s32.totalorder %s815_s21, %s811_s26 }
  0x2d   : > { %312 = vmatpush.msra.mxu0 %v303_v2  ;;  %615 = vmatpush.msra.mxu1 %v303_v2  ;;  %v274_v16 = vld [vmem:[%s1019_s7 + $0x80] sm:$0xff]  ;;  %v275_v20 = vld [vmem:[%s1019_s7 + $0x88] sm:$0xff]  ;;  %v284_v25 = vld [vmem:[%s1019_s7 + $0xd0] sm:$0xff] }
  0x2e   : > { %619 = vmatpush.msra.mxu2 %v302_v3  ;;  %620 = vmatpush.msra.mxu3 %v302_v3  ;;  %v282_v17 = vld [vmem:[%s1019_s7 + $0xc0] sm:$0xff]  ;;  %v283_v21 = vld [vmem:[%s1019_s7 + $0xc8] sm:$0xff]  ;;  %v260_v26 = vld [vmem:[%s1019_s7 + $0x10] sm:$0xff]  ;;  %p813_p4 = pnand %p812_p1, %p990_p5  ;;  %p818_p13 = por %p817_p12, %p816_p10 }
  0x2f   : > { %313 = vmatpush.msra.mxu0 %v302_v3  ;;  %618 = vmatpush.msra.mxu1 %v302_v3  ;;  %v258_v18 = vld [vmem:[%s1019_s7] sm:$0xff]  ;;  %v259_v22 = vld [vmem:[%s1019_s7 + $0x8] sm:$0xff]  ;;  %v268_v27 = vld [vmem:[%s1019_s7 + $0x50] sm:$0xff] }
  0x30   : > { %622 = vmatpush.msra.mxu2 %v301_v4  ;;  %623 = vmatpush.msra.mxu3 %v301_v4  ;;  %v266_v19 = vld [vmem:[%s1019_s7 + $0x40] sm:$0xff]  ;;  %v267_v23 = vld [vmem:[%s1019_s7 + $0x48] sm:$0xff]  ;;  %v277_v28 = vld [vmem:[%s1019_s7 + $0x98] sm:$0xff]  ;;  %p814_p8 = pneg %p813_p4 }
  0x31   : > { %314 = vmatpush.msra.mxu0 %v301_v4  ;;  %621 = vmatpush.msra.mxu1 %v301_v4  ;;  %v285_v29 = vld [vmem:[%s1019_s7 + $0xd8] sm:$0xff]  ;;  %v278_v32 = vld [vmem:[%s1019_s7 + $0xa0] sm:$0xff]  ;;  %v279_v36 = vld [vmem:[%s1019_s7 + $0xa8] sm:$0xff] }
  0x32   : > { %625 = vmatpush.msra.mxu2 %v300_v5  ;;  %626 = vmatpush.msra.mxu3 %v300_v5  ;;  %v261_v30 = vld [vmem:[%s1019_s7 + $0x18] sm:$0xff]  ;;  %v286_v33 = vld [vmem:[%s1019_s7 + $0xe0] sm:$0xff]  ;;  %v287_v37 = vld [vmem:[%s1019_s7 + $0xe8] sm:$0xff]  ;;  %p819_p0 = pnand %p818_p13, %p814_p8 }
  0x33   : > { %315 = vmatpush.msra.mxu0 %v300_v5  ;;  %624 = vmatpush.msra.mxu1 %v300_v5  ;;  %v269_v31 = vld [vmem:[%s1019_s7 + $0x58] sm:$0xff]  ;;  %v262_v34 = vld [vmem:[%s1019_s7 + $0x20] sm:$0xff]  ;;  %v263_v38 = vld [vmem:[%s1019_s7 + $0x28] sm:$0xff] }
  0x34   : > { %628 = vmatpush.msra.mxu2 %v299_v6  ;;  %629 = vmatpush.msra.mxu3 %v299_v6  ;;  %v270_v35 = vld [vmem:[%s1019_s7 + $0x60] sm:$0xff]  ;;  %v271_v39 = vld [vmem:[%s1019_s7 + $0x68] sm:$0xff]  ;;  %v280_v40 = vld [vmem:[%s1019_s7 + $0xb0] sm:$0xff] }
  0x35   : > { %316 = vmatpush.msra.mxu0 %v299_v6  ;;  %627 = vmatpush.msra.mxu1 %v299_v6  ;;  %v288_v41 = vld [vmem:[%s1019_s7 + $0xf0] sm:$0xff]  ;;  %v281_v44 = vld [vmem:[%s1019_s7 + $0xb8] sm:$0xff]  ;;  %v1064_v48 = vld [vmem:[%s1175_s2] ss:$0 sm:$0xff] }
  0x36   : > { %631 = vmatpush.msra.mxu2 %v298_v7  ;;  %632 = vmatpush.msra.mxu3 %v298_v7  ;;  %v264_v42 = vld [vmem:[%s1019_s7 + $0x30] sm:$0xff]  ;;  %v289_v45 = vld [vmem:[%s1019_s7 + $0xf8] sm:$0xff] }
  0x37   : > { %317 = vmatpush.msra.mxu0 %v298_v7  ;;  %630 = vmatpush.msra.mxu1 %v298_v7  ;;  %v272_v43 = vld [vmem:[%s1019_s7 + $0x70] sm:$0xff]  ;;  %v265_v46 = vld [vmem:[%s1019_s7 + $0x38] sm:$0xff] }
  0x38   : > { %634 = vmatpush.msra.mxu2 %v297_v8  ;;  %635 = vmatpush.msra.mxu3 %v297_v8  ;;  %v273_v47 = vld [vmem:[%s1019_s7 + $0x78] sm:$0xff] }
  0x39   : > { %318 = vmatpush.msra.mxu0 %v297_v8  ;;  %633 = vmatpush.msra.mxu1 %v297_v8 }
  0x3a   : > { %637 = vmatpush.msra.mxu2 %v296_v9  ;;  %638 = vmatpush.msra.mxu3 %v296_v9 }
  0x3b   : > { %319 = vmatpush.msra.mxu0 %v296_v9  ;;  %636 = vmatpush.msra.mxu1 %v296_v9 }
  0x3c   : > { %640 = vmatpush.msra.mxu2 %v295_v10  ;;  %641 = vmatpush.msra.mxu3 %v295_v10 }
  0x3d   : > { %320 = vmatpush.msra.mxu0 %v295_v10  ;;  %639 = vmatpush.msra.mxu1 %v295_v10 }
  0x3e   : > { %643 = vmatpush.msra.mxu2 %v294_v11  ;;  %644 = vmatpush.msra.mxu3 %v294_v11 }
  0x3f   : > { %321 = vmatpush.msra.mxu0 %v294_v11  ;;  %642 = vmatpush.msra.mxu1 %v294_v11 }
  0x40   : > { %646 = vmatpush.msra.mxu2 %v293_v12  ;;  %647 = vmatpush.msra.mxu3 %v293_v12 }
  0x41   : > { %322 = vmatpush.msra.mxu0 %v293_v12  ;;  %645 = vmatpush.msra.mxu1 %v293_v12 }
  0x42   : > { %649 = vmatpush.msra.mxu2 %v292_v13  ;;  %650 = vmatpush.msra.mxu3 %v292_v13 }
  0x43   : > { %323 = vmatpush.msra.mxu0 %v292_v13  ;;  %648 = vmatpush.msra.mxu1 %v292_v13 }
  0x44   : > { %652 = vmatpush.msra.mxu2 %v291_v14  ;;  %653 = vmatpush.msra.mxu3 %v291_v14 }
  0x45   : > { %324 = vmatpush.msra.mxu0 %v291_v14  ;;  %651 = vmatpush.msra.mxu1 %v291_v14 }
  0x46   : > { %655 = vmatpush.msra.mxu2 %v290_v15  ;;  %656 = vmatpush.msra.mxu3 %v290_v15 }
  0x47   : > { %374 = vmatmul.f32.vlgmr.msra.gmra.mxu2 %v274_v16  ;;  %398 = vmatmul.f32.vlgmr.msra.gmra.mxu3 %v282_v17 }
  0x48   : > { %325 = vmatpush.msra.mxu0 %v290_v15  ;;  %654 = vmatpush.msra.mxu1 %v290_v15 }
  0x49   : > { %326 = vmatmul.f32.vlgmr.msra.gmra.mxu0 %v258_v18  ;;  %350 = vmatmul.f32.vlgmr.msra.gmra.mxu1 %v266_v19 }
  0x4f   : > { %377 = vmatmul.f32.gmra.mxu2 %v275_v20  ;;  %401 = vmatmul.f32.gmra.mxu3 %v283_v21 }
  0x51   : > { %329 = vmatmul.f32.gmra.mxu0 %v259_v22  ;;  %353 = vmatmul.f32.gmra.mxu1 %v267_v23 }
  0x57   : > { %380 = vmatmul.f32.gmra.mxu2 %v276_v24  ;;  %404 = vmatmul.f32.gmra.mxu3 %v284_v25 }
  0x59   : > { %332 = vmatmul.f32.gmra.mxu0 %v260_v26  ;;  %356 = vmatmul.f32.gmra.mxu1 %v268_v27 }
  0x5f   : > { %383 = vmatmul.f32.gmra.mxu2 %v277_v28  ;;  %407 = vmatmul.f32.gmra.mxu3 %v285_v29 }
  0x61   : > { %335 = vmatmul.f32.gmra.mxu0 %v261_v30  ;;  %359 = vmatmul.f32.gmra.mxu1 %v269_v31 }
  0x67   : > { %386 = vmatmul.f32.gmra.mxu2 %v278_v32  ;;  %410 = vmatmul.f32.gmra.mxu3 %v286_v33 }
  0x69   : > { %338 = vmatmul.f32.gmra.mxu0 %v262_v34  ;;  %362 = vmatmul.f32.gmra.mxu1 %v270_v35 }
  0x6f   : > { %389 = vmatmul.f32.gmra.mxu2 %v279_v36  ;;  %413 = vmatmul.f32.gmra.mxu3 %v287_v37 }
  0x71   : > { %341 = vmatmul.f32.gmra.mxu0 %v263_v38  ;;  %365 = vmatmul.f32.gmra.mxu1 %v271_v39 }
  0x77   : > { %392 = vmatmul.f32.gmra.mxu2 %v280_v40  ;;  %416 = vmatmul.f32.gmra.mxu3 %v288_v41 }
  0x79   : > { %344 = vmatmul.f32.gmra.mxu0 %v264_v42  ;;  %368 = vmatmul.f32.gmra.mxu1 %v272_v43 }
  0x7f   : > { %395 = vmatmul.f32.gmra.mxu2 %v281_v44  ;;  %419 = vmatmul.f32.gmra.mxu3 %v289_v45 }
  0x81   : > { %347 = vmatmul.f32.gmra.mxu0 %v265_v46  ;;  %371 = vmatmul.f32.gmra.mxu1 %v273_v47 }
  0xc6   : > { %v327_v49 = vpop.f32.mrf.mxu0  ;;  %v351_v50 = vpop.f32.mrf.mxu1 }
  0xc7   : > { %v328_v51 = vadd.f32 %v1064_v48, %v327_v49  ;;  %v352_v52 = vadd.f32 %v1064_v48, %v351_v50 }
  0xc9   : > { %423 = vst [vmem:[%s1070_s22] sm:$0xff] %v328_v51 }
  0xca   : > { %431 = vst [vmem:[%s1070_s22 + $0x40] sm:$0xff] %v352_v52  ;;  %v375_v53 = vpop.f32.mrf.mxu2  ;;  %v399_v54 = vpop.f32.mrf.mxu3 }
  0xcb   : > { %v376_v55 = vadd.f32 %v1064_v48, %v375_v53  ;;  %v400_v56 = vadd.f32 %v1064_v48, %v399_v54 }
  0xcd   : > { %439 = vst [vmem:[%s1070_s22 + $0x80] sm:$0xff] %v376_v55 }
  0xce   : > { %447 = vst [vmem:[%s1070_s22 + $0xc0] sm:$0xff] %v400_v56  ;;  %v330_v57 = vpop.f32.mrf.mxu0  ;;  %v354_v58 = vpop.f32.mrf.mxu1 }
  0xcf   : > { %v331_v59 = vadd.f32 %v1064_v48, %v330_v57  ;;  %v355_v60 = vadd.f32 %v1064_v48, %v354_v58 }
  0xd1   : > { %424 = vst [vmem:[%s1070_s22 + $0x8] sm:$0xff] %v331_v59 }
  0xd2   : > { %432 = vst [vmem:[%s1070_s22 + $0x48] sm:$0xff] %v355_v60  ;;  %v378_v61 = vpop.f32.mrf.mxu2  ;;  %v402_v62 = vpop.f32.mrf.mxu3 }
  0xd3   : > { %v379_v63 = vadd.f32 %v1064_v48, %v378_v61  ;;  %v403_v0 = vadd.f32 %v1064_v48, %v402_v62 }
  0xd5   : > { %440 = vst [vmem:[%s1070_s22 + $0x88] sm:$0xff] %v379_v63 }
  0xd6   : > { %448 = vst [vmem:[%s1070_s22 + $0xc8] sm:$0xff] %v403_v0  ;;  %v333_v1 = vpop.f32.mrf.mxu0  ;;  %v357_v2 = vpop.f32.mrf.mxu1 }
  0xd7   : > { %v334_v3 = vadd.f32 %v1064_v48, %v333_v1  ;;  %v358_v4 = vadd.f32 %v1064_v48, %v357_v2 }
  0xd9   : > { %425 = vst [vmem:[%s1070_s22 + $0x10] sm:$0xff] %v334_v3 }
  0xda   : > { %433 = vst [vmem:[%s1070_s22 + $0x50] sm:$0xff] %v358_v4  ;;  %v381_v5 = vpop.f32.mrf.mxu2  ;;  %v405_v6 = vpop.f32.mrf.mxu3 }
  0xdb   : > { %v382_v7 = vadd.f32 %v1064_v48, %v381_v5  ;;  %v406_v8 = vadd.f32 %v1064_v48, %v405_v6 }
  0xdd   : > { %441 = vst [vmem:[%s1070_s22 + $0x90] sm:$0xff] %v382_v7 }
  0xde   : > { %449 = vst [vmem:[%s1070_s22 + $0xd0] sm:$0xff] %v406_v8  ;;  %v336_v9 = vpop.f32.mrf.mxu0  ;;  %v360_v10 = vpop.f32.mrf.mxu1 }
  0xdf   : > { %v337_v11 = vadd.f32 %v1064_v48, %v336_v9  ;;  %v361_v12 = vadd.f32 %v1064_v48, %v360_v10 }
  0xe1   : > { %426 = vst [vmem:[%s1070_s22 + $0x18] sm:$0xff] %v337_v11 }
  0xe2   : > { %434 = vst [vmem:[%s1070_s22 + $0x58] sm:$0xff] %v361_v12  ;;  %v384_v13 = vpop.f32.mrf.mxu2  ;;  %v408_v14 = vpop.f32.mrf.mxu3 }
  0xe3   : > { %v385_v15 = vadd.f32 %v1064_v48, %v384_v13  ;;  %v409_v16 = vadd.f32 %v1064_v48, %v408_v14 }
  0xe5   : > { %442 = vst [vmem:[%s1070_s22 + $0x98] sm:$0xff] %v385_v15 }
  0xe6   : > { %450 = vst [vmem:[%s1070_s22 + $0xd8] sm:$0xff] %v409_v16  ;;  %v339_v17 = vpop.f32.mrf.mxu0  ;;  %v363_v18 = vpop.f32.mrf.mxu1 }
  0xe7   : > { %v340_v19 = vadd.f32 %v1064_v48, %v339_v17  ;;  %v364_v20 = vadd.f32 %v1064_v48, %v363_v18 }
  0xe9   : > { %427 = vst [vmem:[%s1070_s22 + $0x20] sm:$0xff] %v340_v19 }
  0xea   : > { %435 = vst [vmem:[%s1070_s22 + $0x60] sm:$0xff] %v364_v20  ;;  %v387_v21 = vpop.f32.mrf.mxu2  ;;  %v411_v22 = vpop.f32.mrf.mxu3 }
  0xeb   : > { %v388_v23 = vadd.f32 %v1064_v48, %v387_v21  ;;  %v412_v24 = vadd.f32 %v1064_v48, %v411_v22 }
  0xed   : > { %443 = vst [vmem:[%s1070_s22 + $0xa0] sm:$0xff] %v388_v23 }
  0xee   : > { %451 = vst [vmem:[%s1070_s22 + $0xe0] sm:$0xff] %v412_v24  ;;  %v342_v25 = vpop.f32.mrf.mxu0  ;;  %v366_v26 = vpop.f32.mrf.mxu1 }
  0xef   : > { %v343_v27 = vadd.f32 %v1064_v48, %v342_v25  ;;  %v367_v28 = vadd.f32 %v1064_v48, %v366_v26 }
  0xf1   : > { %428 = vst [vmem:[%s1070_s22 + $0x28] sm:$0xff] %v343_v27 }
  0xf2   : > { %436 = vst [vmem:[%s1070_s22 + $0x68] sm:$0xff] %v367_v28  ;;  %v390_v29 = vpop.f32.mrf.mxu2  ;;  %v414_v30 = vpop.f32.mrf.mxu3 }
  0xf3   : > { %v391_v31 = vadd.f32 %v1064_v48, %v390_v29  ;;  %v415_v32 = vadd.f32 %v1064_v48, %v414_v30 }
  0xf5   : > { %444 = vst [vmem:[%s1070_s22 + $0xa8] sm:$0xff] %v391_v31 }
  0xf6   : > { %452 = vst [vmem:[%s1070_s22 + $0xe8] sm:$0xff] %v415_v32  ;;  %v345_v33 = vpop.f32.mrf.mxu0  ;;  %v369_v34 = vpop.f32.mrf.mxu1 }
  0xf7   : > { %v346_v35 = vadd.f32 %v1064_v48, %v345_v33  ;;  %v370_v36 = vadd.f32 %v1064_v48, %v369_v34 }
  0xf9   : > { %429 = vst [vmem:[%s1070_s22 + $0x30] sm:$0xff] %v346_v35 }
  0xfa   : > { %437 = vst [vmem:[%s1070_s22 + $0x70] sm:$0xff] %v370_v36  ;;  %v393_v37 = vpop.f32.mrf.mxu2  ;;  %v417_v38 = vpop.f32.mrf.mxu3 }
  0xfb   : > { %v394_v39 = vadd.f32 %v1064_v48, %v393_v37  ;;  %v418_v40 = vadd.f32 %v1064_v48, %v417_v38 }
  0xfd   : > { %445 = vst [vmem:[%s1070_s22 + $0xb0] sm:$0xff] %v394_v39 }
  0xfe   : > { %453 = vst [vmem:[%s1070_s22 + $0xf0] sm:$0xff] %v418_v40  ;;  %v348_v41 = vpop.f32.mrf.mxu0  ;;  %v372_v42 = vpop.f32.mrf.mxu1 }
  0xff   : > { %v349_v43 = vadd.f32 %v1064_v48, %v348_v41  ;;  %v373_v44 = vadd.f32 %v1064_v48, %v372_v42 }
 0x101   : > { %430 = vst [vmem:[%s1070_s22 + $0x38] sm:$0xff] %v349_v43 }
 0x102   : > { %438 = vst [vmem:[%s1070_s22 + $0x78] sm:$0xff] %v373_v44  ;;  %v396_v45 = vpop.f32.mrf.mxu2  ;;  %v420_v46 = vpop.f32.mrf.mxu3 }
 0x103   : > { %v397_v47 = vadd.f32 %v1064_v48, %v396_v45  ;;  %v421_v49 = vadd.f32 %v1064_v48, %v420_v46 }
 0x105   : > { %446 = vst [vmem:[%s1070_s22 + $0xb8] sm:$0xff] %v397_v47 }
 0x106   : > { %454 = vst [vmem:[%s1070_s22 + $0xf8] sm:$0xff] %v421_v49 }
 0x107   : > { %822 = shalt.err (!%p819_p0)
}
 0x108   : > { %s886_s6 = smov 128   ;;  %s887_s7 = smov 8  }
 0x109   : > { %663 = dma.vmem_to_hbm [thread:$0]  (%p990_p5), %s472_s15, 4096, %s474_s19, %s456_s24, %s886_s6, %s886_s6, %s887_s7  }
 0x10a PF: > { %s488_s1 = sand.u32 1, %s861_s12   ;;  %p674_p3 = pnand %p594_p11, %p957_p6 }
 0x10b   : > { %s489_s20 = scalar_lea.sflag [#allocation4], %s488_s1 }
 0x10c   : > { %p675_p7 = pneg %p674_p3 }
 0x10e   : > { %856 = dma.done.wait (%p675_p7), %s489_s20, 4096  }
 0x10f   : > { %858 = vsyncadd (%p675_p7), %s489_s20, 4294963200  ;;  %s20_s17 = sadd.s32 1, %s881_s17   ;;  %s1188_s12 = smov %s865_s13 }
 0x110   : > { %p17_p9 = scmp.ge.s32.totalorder %s20_s17, 4   ;;  %s1189_s13 = smov %s869_s14 }
 0x111   : > { %s1190_s14 = smov %s999_s18  ;;  %s1191_s15 = smov %s877_s16 }
 0x112   : > { %s1192_s16 = smov %s1194_s5  ;;  %19 = sbr.rel (!%p17_p9) target bundleno = 9 (0x9), region = 85 }
 0x117   :  { %495 = vsyncpa [#allocation3], 1 }
 0x118   :  { %497 = vsyncpa [#allocation3 + $0x1], 1 }
 0x119   :  { %498 = vsyncpa [#allocation6], 1 }
 0x11a   :  { %499 = vsyncpa [#allocation4], 1 }
 0x11b   :  { %501 = vsyncpa [#allocation4 + $0x1], 1 }

</bundles_post_ra>
